<compile_context>
chip_gen: v5e
topology: v5e:2x2
jax: 0.10.0
libtpu: 0.0.40
codegen_flags: <defaults>
</compile_context>

<pallas_src>
import functools
import math

import jax
import jax.numpy as jnp
from jax.experimental import pallas as pl
from jax.experimental.pallas import tpu as pltpu

C = 40.0
dim_h = 50            # feature dim of the module is 2 * dim_h = 100


def _pos_weight_kernel(end_ref, slen_ref, inc_ref, tlc_ref, tok_ref,
                       data_ref, out_ref, *, pos_per_block, inv_c):
    """One (tb, tcol) tile of the flattened (B, L*D) view.

    end/slen/inc/tlc : (tb, 1) f32 per-batch params
        end  = aspect_index + aspect_len   (exact integer-valued)
        slen = sents_len                   (exact integer-valued)
        inc  = 1 - end / C                 (folded "inside" constant)
        tlc  = 1 + aspect_index / C        (folded "tail"   constant)
    tok : (1, tcol) f32 block-local token index of every flattened column;
        identical for every column block (tcol is a whole number of tokens),
        so it is DMA'd once per core and removes the per-element iota/floor.
    """
    pos_base = (pl.program_id(1) * pos_per_block).astype(jnp.float32)
    pos = tok_ref[...] + pos_base          # (1, tcol), exact integer-valued f32
    pos_scaled = pos * inv_c               # pos / C

    w_inside = inc_ref[...] + pos_scaled   # == 1 - (end - pos)/C
    w_tail = tlc_ref[...] - pos_scaled     # == 1 - (pos - aspect_index)/C
    # Exact integer comparisons pick the branch; padded tail positions compute
    # garbage weights but their stores are masked by Pallas.
    w = jnp.where(pos < end_ref[...], w_inside,
                  jnp.where(pos < slen_ref[...], w_tail, 0.0))
    out_ref[...] = (data_ref[...] * w).astype(out_ref.dtype)


def _choose_tiles(B, L, D, itemsize, target_block_bytes=1 << 20):
    """Pick (row_tile, col_tile) for the flattened (B, L*D) view.

    Row tile first (full batch if B<=8, else 8), then the column tile from the
    per-block budget / row count.  Column tiles are multiples of lcm(128, D)
    (lane-dense stores, token-aligned block boundaries) and prefer dividing
    L*D so the last block is not a masked partial tile.  ~1 MiB blocks ->
    ~4 MiB double-buffered VMEM, safe on v5e/v6e/v7x defaults.
    """
    LD = L * D
    tb = B if B <= 8 else 8
    step = (128 * D) // math.gcd(128, D)          # lcm(128, D)
    col_budget = max(1, target_block_bytes // (tb * itemsize))   # elems per row-chunk

    if LD <= col_budget:
        tcol = LD
    elif step > col_budget:
        # A single lcm unit exceeds the soft target (only for very large, odd
        # feature dims).  Take one unit; the explicit vmem_limit in the wrapper
        # still accounts for the real footprint.
        tcol = min(step, LD)
    else:
        maxk = col_budget // step
        tcol = maxk * step
        for k in range(maxk, 0, -1):              # prefer a tile that divides LD
            if LD % (k * step) == 0:
                tcol = k * step
                break

    # Avoid a degenerate (1, 1) grid (no pipelining, single v7x TensorCore)
    # whenever the column axis can be split on token+lane boundaries.
    if B <= tb and tcol >= LD and LD >= 2 * step:
        k = max(1, (LD // step) // 2)
        tcol = k * step
    return tb, tcol


@jax.jit
def convolution_feature_extractor(data, aspect_index, aspect_len, sents_len):
    """data: (B, L, D) float; aspect_index/aspect_len/sents_len: (B,) ints."""
    B, L, D = data.shape
    LD = L * D
    assert L < (1 << 24), "token index must stay exact in f32"
    data2 = data.reshape(B, LD)          # contiguous collapse -> no copy

    inv_c = 1.0 / C
    a_f = aspect_index.astype(jnp.float32).reshape(B, 1)
    end_f = (aspect_index + aspect_len).astype(jnp.float32).reshape(B, 1)
    slen_f = sents_len.astype(jnp.float32).reshape(B, 1)
    inside_c = 1.0 - end_f * inv_c       # folded constants (saves VALU ops/elem)
    tail_c = 1.0 + a_f * inv_c

    itemsize = jnp.dtype(data.dtype).itemsize
    tb, tcol = _choose_tiles(B, L, D, itemsize)
    assert tcol % D == 0, "column tile must cover whole tokens"
    pos_per_block = tcol // D
    grid = (pl.cdiv(B, tb), pl.cdiv(LD, tcol))

    # Block-local token index of each flattened column; same for every column
    # block, so its BlockSpec index is constant -> fetched once per core.
    tok = (jnp.arange(tcol, dtype=jnp.int32) // D).astype(jnp.float32).reshape(1, tcol)

    # Explicit VMEM budget: 2x(data in) + 2x(out) + 2x(tok) + params + slack.
    block_bytes = tb * tcol * itemsize
    vmem_limit = int(max(4 * block_bytes + 2 * tcol * 4 + (2 << 20), 4 << 20))

    kernel = functools.partial(_pos_weight_kernel,
                               pos_per_block=pos_per_block, inv_c=inv_c)
    param_spec = pl.BlockSpec((tb, 1), lambda bi, cj: (bi, 0))
    tok_spec = pl.BlockSpec((1, tcol), lambda bi, cj: (0, 0))
    data_spec = pl.BlockSpec((tb, tcol), lambda bi, cj: (bi, cj))

    out2 = pl.pallas_call(
        kernel,
        out_shape=jax.ShapeDtypeStruct((B, LD), data.dtype),
        grid_spec=pltpu.PrefetchScalarGridSpec(
            num_scalar_prefetch=0,
            grid=grid,
            in_specs=[param_spec, param_spec, param_spec, param_spec,
                      tok_spec, data_spec],
            out_specs=data_spec,
        ),
        compiler_params=pltpu.CompilerParams(
            dimension_semantics=("parallel", "parallel"),
            vmem_limit_bytes=vmem_limit),
    )(end_f, slen_f, inside_c, tail_c, tok, data2)

    return out2.reshape(B, L, D)


def _reference(data, aspect_index, aspect_len, sents_len):
    B, L, D = data.shape
    i = jnp.arange(L)[None, :]                       # (1, L)
    end = (aspect_index + aspect_len)[:, None]       # (B, 1)
    a = aspect_index[:, None].astype(jnp.float32)
    end_f = end.astype(jnp.float32)
    i_f = i.astype(jnp.float32)
    sl = sents_len[:, None]
    w = jnp.where(i < end, 1.0 - (end_f - i_f) / C,
                  jnp.where(i < sl, 1.0 - (i_f - a) / C, 0.0))
    return data * w[:, :, None]


if __name__ == "__main__":
    D = 2 * dim_h  # 100
    k0, k1 = jax.random.split(jax.random.PRNGKey(0))

    # Case 1: multi-column-block grid (exercises pos_base offsets + masked tail).
    B, L = 2, 80
    data = jax.random.normal(k0, (B, L, D), dtype=jnp.float32)
    aspect_index = jnp.array([3, 5], dtype=jnp.int32)
    aspect_len = jnp.array([2, 3], dtype=jnp.int32)
    sents_len = jnp.array([60, 75], dtype=jnp.int32)

    out = convolution_feature_extractor(data, aspect_index, aspect_len, sents_len)
    out = jax.block_until_ready(out)
    ref = _reference(data, aspect_index, aspect_len, sents_len)
    assert jnp.allclose(out, ref, atol=1e-5, rtol=1e-5), "mismatch (multi-block)"

    # Case 2: tiny single-block path (full-row column tile).
    B2, L2 = 2, 16
    data2 = jax.random.normal(k1, (B2, L2, D), dtype=jnp.float32)
    ai2 = jnp.array([3, 5], dtype=jnp.int32)
    al2 = jnp.array([2, 3], dtype=jnp.int32)
    sl2 = jnp.array([10, 14], dtype=jnp.int32)
    out2 = jax.block_until_ready(convolution_feature_extractor(data2, ai2, al2, sl2))
    ref2 = _reference(data2, ai2, al2, sl2)
    assert jnp.allclose(out2, ref2, atol=1e-5, rtol=1e-5), "mismatch (single-block)"

    print("KERNEL_OK")
</pallas_src>

<mosaic_0001>
module attributes {stable_mosaic.version = 11 : i64} {
  func.func @_pos_weight_kernel(%arg0: i32, %arg1: i32, %arg2: memref<2x1xf32, #tpu.memory_space<vmem>>, %arg3: memref<2x1xf32, #tpu.memory_space<vmem>>, %arg4: memref<2x1xf32, #tpu.memory_space<vmem>>, %arg5: memref<2x1xf32, #tpu.memory_space<vmem>>, %arg6: memref<1x3200xf32, #tpu.memory_space<vmem>>, %arg7: memref<2x3200xf32, #tpu.memory_space<vmem>>, %arg8: memref<2x3200xf32, #tpu.memory_space<vmem>>) attributes {dimension_semantics = [#tpu.dimension_semantics<parallel>, #tpu.dimension_semantics<parallel>], iteration_bounds = array<i64: 1, 3>, scalar_prefetch = 0 : i64, scratch_operands = 0 : i64, tpu.core_type = #tpu.core_type<tc>, window_params = [{transform_indices = @transform_0, window_bounds = array<i64: 2, 1>}, {transform_indices = @transform_1, window_bounds = array<i64: 2, 1>}, {transform_indices = @transform_2, window_bounds = array<i64: 2, 1>}, {transform_indices = @transform_3, window_bounds = array<i64: 2, 1>}, {pipeline_mode = #tpu.pipeline_mode<synchronous>, transform_indices = @transform_4, window_bounds = array<i64: 1, 3200>}, {transform_indices = @transform_5, window_bounds = array<i64: 2, 3200>}, {transform_indices = @transform_6, window_bounds = array<i64: 2, 3200>}]} {
    %c32_i32 = arith.constant 32 : i32
    %0 = arith.muli %arg1, %c32_i32 : i32
    %1 = arith.sitofp %0 : i32 to f32
    %c0 = arith.constant 0 : index
    %c0_0 = arith.constant 0 : index
    %2 = vector.load %arg6[%c0, %c0_0] : memref<1x3200xf32, #tpu.memory_space<vmem>>, vector<1x3200xf32>
    %3 = vector.broadcast %1 : f32 to vector<1x3200xf32>
    %4 = arith.addf %2, %3 : vector<1x3200xf32>
    %cst = arith.constant 2.500000e-02 : f32
    %5 = vector.broadcast %cst : f32 to vector<1x3200xf32>
    %6 = arith.mulf %4, %5 : vector<1x3200xf32>
    %c0_1 = arith.constant 0 : index
    %c0_2 = arith.constant 0 : index
    %7 = vector.load %arg4[%c0_1, %c0_2] : memref<2x1xf32, #tpu.memory_space<vmem>>, vector<2x1xf32>
    %8 = vector.broadcast %7 : vector<2x1xf32> to vector<2x3200xf32>
    %9 = vector.broadcast %6 : vector<1x3200xf32> to vector<2x3200xf32>
    %10 = arith.addf %8, %9 : vector<2x3200xf32>
    %c0_3 = arith.constant 0 : index
    %c0_4 = arith.constant 0 : index
    %11 = vector.load %arg5[%c0_3, %c0_4] : memref<2x1xf32, #tpu.memory_space<vmem>>, vector<2x1xf32>
    %12 = vector.broadcast %11 : vector<2x1xf32> to vector<2x3200xf32>
    %13 = vector.broadcast %6 : vector<1x3200xf32> to vector<2x3200xf32>
    %14 = arith.subf %12, %13 : vector<2x3200xf32>
    %c0_5 = arith.constant 0 : index
    %c0_6 = arith.constant 0 : index
    %15 = vector.load %arg2[%c0_5, %c0_6] : memref<2x1xf32, #tpu.memory_space<vmem>>, vector<2x1xf32>
    %16 = vector.broadcast %4 : vector<1x3200xf32> to vector<2x3200xf32>
    %17 = vector.broadcast %15 : vector<2x1xf32> to vector<2x3200xf32>
    %18 = arith.cmpf olt, %16, %17 : vector<2x3200xf32>
    %c0_7 = arith.constant 0 : index
    %c0_8 = arith.constant 0 : index
    %19 = vector.load %arg3[%c0_7, %c0_8] : memref<2x1xf32, #tpu.memory_space<vmem>>, vector<2x1xf32>
    %20 = vector.broadcast %4 : vector<1x3200xf32> to vector<2x3200xf32>
    %21 = vector.broadcast %19 : vector<2x1xf32> to vector<2x3200xf32>
    %22 = arith.cmpf olt, %20, %21 : vector<2x3200xf32>
    %cst_9 = arith.constant 0.000000e+00 : f32
    %23 = vector.broadcast %cst_9 : f32 to vector<2x3200xf32>
    %24 = arith.select %22, %14, %23 : vector<2x3200xi1>, vector<2x3200xf32>
    %25 = arith.select %18, %10, %24 : vector<2x3200xi1>, vector<2x3200xf32>
    %c0_10 = arith.constant 0 : index
    %c0_11 = arith.constant 0 : index
    %26 = vector.load %arg7[%c0_10, %c0_11] : memref<2x3200xf32, #tpu.memory_space<vmem>>, vector<2x3200xf32>
    %27 = arith.mulf %26, %25 : vector<2x3200xf32>
    %c0_12 = arith.constant 0 : index
    %c0_13 = arith.constant 0 : index
    %28 = vector.load %arg8[%c0_12, %c0_13] : memref<2x3200xf32, #tpu.memory_space<vmem>>, vector<2x3200xf32>
    tpu.vector_store %arg8[%c0_12, %c0_13], %27 {strides = array<i32>} : memref<2x3200xf32, #tpu.memory_space<vmem>>, vector<2x3200xf32>,
    return
  }
  func.func @transform_0(%arg0: i32, %arg1: i32) -> (i32, i32) {
    %c0_i32 = arith.constant 0 : i32
    %c0_i32_0 = arith.constant 0 : i32
    return %arg0, %c0_i32 : i32, i32
  }
  func.func @transform_1(%arg0: i32, %arg1: i32) -> (i32, i32) {
    %c0_i32 = arith.constant 0 : i32
    %c0_i32_0 = arith.constant 0 : i32
    return %arg0, %c0_i32 : i32, i32
  }
  func.func @transform_2(%arg0: i32, %arg1: i32) -> (i32, i32) {
    %c0_i32 = arith.constant 0 : i32
    %c0_i32_0 = arith.constant 0 : i32
    return %arg0, %c0_i32 : i32, i32
  }
  func.func @transform_3(%arg0: i32, %arg1: i32) -> (i32, i32) {
    %c0_i32 = arith.constant 0 : i32
    %c0_i32_0 = arith.constant 0 : i32
    return %arg0, %c0_i32 : i32, i32
  }
  func.func @transform_4(%arg0: i32, %arg1: i32) -> (i32, i32) {
    %c0_i32 = arith.constant 0 : i32
    %c0_i32_0 = arith.constant 0 : i32
    %c0_i32_1 = arith.constant 0 : i32
    return %c0_i32, %c0_i32_0 : i32, i32
  }
  func.func @transform_5(%arg0: i32, %arg1: i32) -> (i32, i32) {
    %c0_i32 = arith.constant 0 : i32
    return %arg0, %arg1 : i32, i32
  }
  func.func @transform_6(%arg0: i32, %arg1: i32) -> (i32, i32) {
    %c0_i32 = arith.constant 0 : i32
    return %arg0, %arg1 : i32, i32
  }
}

</mosaic_0001>

<bundles_post_ra>
// kernel: convolution_feature_extractor.1
= control target key start
LH: loop header
LB: loop body
LE: loop exit
PB: predicated region body
PF: predicated region fallthrough
CT: control target
= control target key end

     0   :  { %s1675_s21 = smov 0   ;;  %s1677_s22 = smov 0   ;;  %s2888_s0 = inlined_call_operand.vmem [shape: f32[2,1], index: 0, kind: input, shape index: {}]   ;;  %s2889_s1 = inlined_call_operand.vmem [shape: f32[2,1], index: 1, kind: input, shape index: {}]   ;;  %s2890_s2 = inlined_call_operand.vmem [shape: f32[2,1], index: 2, kind: input, shape index: {}]   ;;  %s2891_s3 = inlined_call_operand.vmem [shape: f32[2,1], index: 3, kind: input, shape index: {}]   ;;  %s2892_s4 = inlined_call_operand.vmem [shape: f32[1,3200], index: 4, kind: input, shape index: {}]   ;;  %s2893_s5 = inlined_call_operand.vmem [shape: f32[2,8000], index: 5, kind: input, shape index: {}]   ;;  %s2894_s6 = inlined_call_operand.vmem [shape: f32[2,8000], index: 6, kind: output, shape index: {}]  }
   0x1   :  { %s1679_s23 = smov 0   ;;  %s1681_s24 = smov 0  }
   0x2   :  { %s1683_s25 = smov 0  }
   0x3 LB: > { %s1250_s26 = sadd.s32 4294967295, %s1571_s25   ;;  %s25_s27 = sadd.s32 1, %s1567_s24  ;;  %s1571_s25 = sphi %s1683_s25, %s16_s25   ;;  %s1567_s24 = sphi %s1681_s24, %s3237_s24   ;;  %s1563_s23 = sphi %s1679_s23, %s3236_s23   ;;  %s1559_s22 = sphi %s1677_s22, %s3235_s22   ;;  %s1555_s21 = sphi %s1675_s21, %s3234_s21  }
   0x4   : > { %p26_p0 = scmp.ge.s32.totalorder %s25_s27, 3  ;;  %s190_s28 = sadd.s32 1, %s1559_s22 }
   0x5   : > { %p200_p1 = scmp.ne.s32.totalorder %s1559_s22, %s1555_s21  ;;  %p201_p2 = scmp.eq.s32.totalorder %s1250_s26, 2 }
   0x6   : > { %s3239_s27 = smov (%p26_p0, %s25_s27), 0  ;;  %p1258_p4 = scmp.ge.s32.totalorder %s1571_s25, 1 }
   0x7   : > { %p1707_p3 = por %p201_p2, %p200_p1  ;;  %s186_s30 = ssub.s32 %s1567_s24, %s3239_s27 }
   0x8   : > { %p277_p5 = scmp.lt.s32.totalorder %s1571_s25, 4  ;;  %p188_p6 = scmp.eq.s32.totalorder %s186_s30, 0 }
   0xa   : > { %p278_p7 = pnand %p1258_p4, %p277_p5 }
   0xb   : > { %s1716_s7 = scalar_select %p188_p6, %s1559_s22, %s190_s28  }
   0xc   : > { %281 = sbr.rel (%p278_p7) target bundleno = 378 (0x17a), region = 44 }
  0x11   : > { %v585_v0 = vld [vmem:[%s2889_s1] sm:$0x3]  ;;  %v1637_v2 = vmov 0   ;;  %s1260_s16 = sshll.u32 %s1563_s23, 5  ;;  %v372_v7 = vld [vmem:[%s2892_s4 + $0x8] sm:$0xff]  ;;  %v373_v8 = vld [vmem:[%s2892_s4 + $0x10] sm:$0xff] }
  0x12   : > { %v469_v1 = vld [vmem:[%s2891_s3] sm:$0x3]  ;;  %1468 = vset.pattern.permute.xlu1 %v1637_v2  ;;  %1467 = vset.pattern.permute.xlu0 %v1637_v2  ;;  %s370_s17 = scvt.s32.f32 %s1260_s16  ;;  %v374_v9 = vld [vmem:[%s2892_s4 + $0x18] sm:$0x1]  ;;  %s2408_s10 = smul.u32 25, %s1563_s23 }
  0x13   : > { %588 = vperm.xlu1 %1468, %v585_v0   ;;  %472 = vperm.xlu0 %1467, %v469_v1   ;;  %v500_v3 = vld [vmem:[%s2888_s0] sm:$0x3]  ;;  %s327_s13 = sand.u32 1, %s1555_s21   ;;  %s1290_s19 = smul.u32 (%p1707_p3), 50, %s1563_s23 }
  0x14   : > { %v384_v4 = vld [vmem:[%s2890_s2] sm:$0x3]  ;;  %v375_v6 = vstv %s370_s17  ;;  %p353_p8 = scmp.lt.s32.totalorder %s2408_s10, 62  ;;  %s1295_s21 = smul.u32 50, %s327_s13 }
  0x15   : > { %v371_v5 = vld [vmem:[%s2892_s4] sm:$0xff]  ;;  %v1745_v11 = vadd.f32 %v375_v6, %v372_v7  ;;  %v1747_v12 = vadd.f32 %v375_v6, %v373_v8  ;;  %v1749_v13 = vadd.f32 %v375_v6, %v374_v9  ;;  %s764_s18 = ssub.s32 (%p1707_p3), 63, %s2408_s10  ;;  %s2595_s28 = scalar_lea.vmem (%p1707_p3), %s2894_s6, %s1290_s19  }
  0x16   : > { %v1743_v10 = vadd.f32 %v375_v6, %v371_v5  ;;  %s2510_s11 = scalar_select %p353_p8, %s2408_s10, 62 }
  0x17   : > { %2951 = vst [vmem:[#allocation3_spill] sm:$0xff] %v1749_v13  ;;  %v2902_v23 = vperm.slane %v1745_v11, 0  ;;  %v2903_v24 = vperm.slane %v1745_v11, 1  ;;  %v2904_v25 = vperm.slane %v1745_v11, 2  ;;  %v2908_v26 = vperm.slane %v1745_v11, 3  ;;  %s2579_s17 = scalar_lea.vmem [#allocation2], %s1295_s21  }
  0x18   : > { %v2895_v14 = vperm.slane %v1743_v10, 0  ;;  %v2896_v15 = vperm.slane %v1743_v10, 1  ;;  %v2897_v16 = vperm.slane %v1743_v10, 2  ;;  %v2898_v17 = vperm.slane %v1743_v10, 3  ;;  %s1259_s12 = sshll.u32 %s2510_s11, 1  ;;  %p765_p9 = scmp.lt.s32.totalorder (%p1707_p3), %s764_s18, 25 }
  0x19   : > { %v2899_v18 = vperm.slane %v1743_v10, 4  ;;  %v2900_v19 = vperm.slane %v1743_v10, 5  ;;  %v2901_v20 = vperm.slane %v1743_v10, 6  ;;  %v2905_v22 = vperm.slane %v1743_v10, 7  ;;  %s358_s16 = scalar_lea.vmem %s2893_s5, %s1259_s12 }
  0x1a   : > { %v2909_v27 = vperm.slane %v1745_v11, 4  ;;  %v2911_v28 = vperm.slane %v1745_v11, 5  ;;  %v1768_v29 = vmul.f32 0.025, %v1743_v10  ;;  %v2912_v30 = vperm.slane %v1745_v11, 6 }
  0x1b   : > { %557 = vperm.xlu1 %1468, %v500_v3   ;;  %387 = vperm.xlu0 %1467, %v384_v4   ;;  %v2916_v31 = vperm.slane %v1745_v11, 7  ;;  %v2917_v32 = vperm.slane %v1747_v12, 0  ;;  %v2919_v33 = vperm.slane %v1747_v12, 1  ;;  %v2920_v34 = vperm.slane %v1747_v12, 2 }
  0x1c   : > { %v2924_v35 = vperm.slane %v1747_v12, 3  ;;  %v2925_v36 = vperm.slane %v1747_v12, 4  ;;  %v1778_v37 = vmul.f32 0.025, %v1745_v11  ;;  %v2927_v38 = vperm.slane %v1747_v12, 5 }
  0x1d   : > { %v2928_v39 = vperm.slane %v1747_v12, 6  ;;  %v1785_v42 = vmul.f32 0.025, %v1747_v12  ;;  %v1788_v43 = vmul.f32 0.025, %v1749_v13  ;;  %v394_v44 = vperm.slane %v1768_v29, 0 }
  0x1e   : > { %v395_v45 = vperm.slane %v1768_v29, 1  ;;  %v396_v47 = vperm.slane %v1768_v29, 2  ;;  %v397_v48 = vperm.slane %v1768_v29, 3  ;;  %v398_v49 = vperm.slane %v1768_v29, 4 }
  0x1f   : > { %v399_v50 = vperm.slane %v1768_v29, 5  ;;  %v400_v51 = vperm.slane %v1768_v29, 6  ;;  %v2910_v52 = vperm.slane %v1768_v29, 7  ;;  %v2906_v53 = vperm.slane %v1778_v37, 0 }
  0x20   : > { %v2907_v54 = vperm.slane %v1778_v37, 1  ;;  %v2913_v55 = vperm.slane %v1778_v37, 2  ;;  %v2914_v56 = vperm.slane %v1778_v37, 3  ;;  %v2918_v57 = vperm.slane %v1778_v37, 4 }
  0x21   : > { %v2915_v58 = vperm.slane %v1778_v37, 5  ;;  %v2921_v59 = vperm.slane %v1778_v37, 6  ;;  %v2922_v60 = vperm.slane %v1778_v37, 7  ;;  %v2926_v61 = vperm.slane %v1785_v42, 0 }
  0x22   : > { %v2923_v62 = vperm.slane %v1785_v42, 1 }
  0x85   : > { %v1758_v21 = vpop.permute.xlu0 %472  ;;  %v1792_v46 = vpop.permute.xlu1 %588 }
  0x86   : > { %v1820_v7 = vsub.f32 %v1758_v21, %v394_v44  ;;  %v1823_v8 = vsub.f32 %v1758_v21, %v395_v45  ;;  %v1826_v9 = vsub.f32 %v1758_v21, %v396_v47  ;;  %v1829_v41 = vsub.f32 %v1758_v21, %v397_v48 }
  0x87   : > { %v1832_v40 = vsub.f32 %v1758_v21, %v398_v49  ;;  %vm1837_vm0 = vcmp.lt.f32.partialorder %v2895_v14, %v1792_v46  ;;  %vm1844_vm1 = vcmp.lt.f32.partialorder %v2896_v15, %v1792_v46  ;;  %vm1851_vm2 = vcmp.lt.f32.partialorder %v2897_v16, %v1792_v46 }
  0x88   : > { %v1862_v2 = vsub.f32 %v1758_v21, %v399_v50  ;;  %v1865_v15 = vsub.f32 %v1758_v21, %v400_v51  ;;  %vm1870_vm3 = vcmp.lt.f32.partialorder %v2898_v17, %v1792_v46  ;;  %vm1877_vm4 = vcmp.lt.f32.partialorder %v2899_v18, %v1792_v46 }
  0x89   : > { %vm1884_vm5 = vcmp.lt.f32.partialorder %v2900_v19, %v1792_v46  ;;  %vm1891_vm6 = vcmp.lt.f32.partialorder %v2901_v20, %v1792_v46  ;;  %vm1910_vm7 = vcmp.lt.f32.partialorder %v2905_v22, %v1792_v46  ;;  %vm1917_vm8 = vcmp.lt.f32.partialorder %v2902_v23, %v1792_v46 }
  0x8a   : > { %vm1924_vm9 = vcmp.lt.f32.partialorder %v2903_v24, %v1792_v46  ;;  %vm1931_vm10 = vcmp.lt.f32.partialorder %v2904_v25, %v1792_v46  ;;  %vm1958_vm11 = vcmp.lt.f32.partialorder %v2908_v26, %v1792_v46  ;;  %vm1965_vm12 = vcmp.lt.f32.partialorder %v2909_v27, %v1792_v46 }
  0x8b   : > { %vm1972_vm13 = vcmp.lt.f32.partialorder %v2911_v28, %v1792_v46  ;;  %vm1979_vm14 = vcmp.lt.f32.partialorder %v2912_v30, %v1792_v46  ;;  %v2988_v26 = vmov 0  ;;  %vm2006_vm15 = vcmp.lt.f32.partialorder %v2916_v31, %v1792_v46 }
  0x8c   : > { %v2989_v26 = vsel %vm1979_vm14, 4294967295, %v2988_v26  ;;  %vm2013_vm14 = vcmp.lt.f32.partialorder %v2917_v32, %v1792_v46  ;;  %v3000_v31 = vmov 0  ;;  %v619_v5 = vsel %vm1870_vm3, %v1829_v41, 0.0 }
  0x8d   : > { %v1810_v63 = vpop.permute.xlu0 %387  ;;  %v1953_v22 = vpop.permute.xlu1 %557  ;;  %v620_v4 = vsel %vm1877_vm4, %v1832_v40, 0.0 }
  0x8e   : > { %v1856_v3 = vadd.f32 %v394_v44, %v1810_v63  ;;  %v1859_v14 = vadd.f32 %v395_v45, %v1810_v63  ;;  %v1896_v1 = vadd.f32 %v396_v47, %v1810_v63  ;;  %v1899_v18 = vadd.f32 %v397_v48, %v1810_v63 }
  0x8f   : > { %v1902_v0 = vadd.f32 %v398_v49, %v1810_v63  ;;  %v1905_v19 = vadd.f32 %v399_v50, %v1810_v63  ;;  %v1936_v50 = vadd.f32 %v400_v51, %v1810_v63  ;;  %v1941_v23 = vadd.f32 %v2910_v52, %v1810_v63 }
  0x90   : > { %2966 = vst [vmem:[#allocation4_spill] sm:$0xff] %v1896_v1  ;;  %v1946_v24 = vadd.f32 %v2906_v53, %v1810_v63  ;;  %v1951_v25 = vadd.f32 %v2907_v54, %v1810_v63  ;;  %v2984_v53 = vmov 0  ;;  %v2986_v54 = vmov 0 }
  0x91   : > { %2967 = vst [vmem:[#allocation5_spill] sm:$0xff] %v1899_v18  ;;  %v2985_v53 = vsel %vm1965_vm12, 4294967295, %v2984_v53  ;;  %v2987_v54 = vsel %vm1972_vm13, 4294967295, %v2986_v54  ;;  %v1986_v27 = vadd.f32 %v2913_v55, %v1810_v63  ;;  %v1991_v52 = vadd.f32 %v2914_v56, %v1810_v63 }
  0x92   : > { %2968 = vst [vmem:[#allocation6_spill] sm:$0xff] %v1902_v0  ;;  %v1996_v28 = vadd.f32 %v2918_v57, %v1810_v63  ;;  %v2001_v30 = vadd.f32 %v2915_v58, %v1810_v63  ;;  %v2994_v55 = vmov 0  ;;  %v2996_v56 = vmov 0 }
  0x93   : > { %2969 = vst [vmem:[#allocation7_spill] sm:$0xff] %v1905_v19  ;;  %v2995_v55 = vsel %vm2006_vm15, 4294967295, %v2994_v55  ;;  %v2997_v56 = vsel %vm2013_vm14, 4294967295, %v2996_v56  ;;  %vm2020_vm13 = vcmp.lt.f32.partialorder %v2919_v33, %v1792_v46  ;;  %v2998_v58 = vmov 0 }
  0x94   : > { %2978 = vst [vmem:[#allocation8_spill] sm:$0xff] %v1936_v50  ;;  %v2999_v58 = vsel %vm2020_vm13, 4294967295, %v2998_v58  ;;  %vm2027_vm12 = vcmp.lt.f32.partialorder %v2920_v34, %v1792_v46  ;;  %v2034_v32 = vadd.f32 %v2921_v59, %v1810_v63  ;;  %v2039_v57 = vadd.f32 %v2922_v60, %v1810_v63 }
  0x95   : > { %2979 = vst [vmem:[#allocation9_spill] sm:$0xff] %v1941_v23  ;;  %v3001_v31 = vsel %vm2027_vm12, 4294967295, %v3000_v31  ;;  %v2044_v33 = vadd.f32 %v2926_v61, %v1810_v63  ;;  %v2049_v34 = vadd.f32 %v2923_v62, %v1810_v63  ;;  %vm2054_vm12 = vcmp.lt.f32.partialorder %v2924_v35, %v1792_v46 }
  0x96   : > { %2980 = vst [vmem:[#allocation10_spill] sm:$0xff] %v1946_v24  ;;  %v3006_v59 = vmov 0  ;;  %vm2061_vm13 = vcmp.lt.f32.partialorder %v2925_v36, %v1792_v46  ;;  %v3008_v60 = vmov 0  ;;  %vm2068_vm14 = vcmp.lt.f32.partialorder %v2927_v38, %v1792_v46 }
  0x97   : > { %2981 = vst [vmem:[#allocation11_spill] sm:$0xff] %v1951_v25  ;;  %v3007_v59 = vsel %vm2054_vm12, 4294967295, %v3006_v59  ;;  %v3009_v60 = vsel %vm2061_vm13, 4294967295, %v3008_v60  ;;  %v3010_v62 = vmov 0  ;;  %vm2075_vm15 = vcmp.lt.f32.partialorder %v2928_v39, %v1792_v46 }
  0x98   : > { %2990 = vst [vmem:[#allocation12_spill] sm:$0xff] %v1986_v27  ;;  %v3011_v62 = vsel %vm2068_vm14, 4294967295, %v3010_v62  ;;  %v3012_v35 = vmov 0  ;;  %v3014_v36 = vperm.slane %v1785_v42, 2  ;;  %v3018_v38 = vperm.slane %v1785_v42, 4 }
  0x99   : > { %2991 = vst [vmem:[#allocation13_spill] sm:$0xff] %v1991_v52  ;;  %v3013_v35 = vsel %vm2075_vm15, 4294967295, %v3012_v35  ;;  %v3020_v39 = vperm.slane %v1785_v42, 5  ;;  %v3061_v24 = vperm.slane %v1743_v10, 6  ;;  %v3066_v23 = vmov 0  ;;  %v3164_v45 = vld [vmem:[#allocation6_spill] sm:$0xff] }
  0x9a   : > { %2992 = vst [vmem:[#allocation14_spill] sm:$0xff] %v1996_v28  ;;  %v2082_v61 = vadd.f32 %v3014_v36, %v1810_v63  ;;  %v3023_v36 = vmov 0  ;;  %v3074_v50 = vmov 0  ;;  %v3086_v19 = vmov 0  ;;  %v3167_v49 = vld [vmem:[#allocation7_spill] sm:$0xff] }
  0x9b   : > { %2993 = vst [vmem:[#allocation15_spill] sm:$0xff] %v2001_v30  ;;  %v3022_v30 = vperm.slane %v1743_v10, 0  ;;  %v3114_v18 = vmov 0  ;;  %v3126_v1 = vmov 0  ;;  %vm3146_vm3 = vnez %v2995_v55 }
  0x9c   : > { %3002 = vst [vmem:[#allocation16_spill] sm:$0xff] %v2034_v32  ;;  %v2097_v32 = vadd.f32 %v3020_v39, %v1810_v63  ;;  %v3029_v39 = vmov 0  ;;  %vm3147_vm4 = vnez %v2997_v56 }
  0x9d   : > { %3003 = vst [vmem:[#allocation17_spill] sm:$0xff] %v2039_v57  ;;  %v2092_v57 = vadd.f32 %v3018_v38, %v1810_v63  ;;  %vm2102_vm15 = vcmp.lt.f32.partialorder %v3022_v30, %v1953_v22  ;;  %v3028_v38 = vperm.slane %v1747_v12, 7  ;;  %v3031_v30 = vperm.slane %v1749_v13, 0 }
  0x9e   : > { %3004 = vst [vmem:[#allocation18_spill] sm:$0xff] %v2044_v33  ;;  %v3024_v36 = vsel %vm2102_vm15, 4294967295, %v3023_v36  ;;  %v3041_v13 = vperm.slane %v1743_v10, 2 }
  0x9f   : > { %3005 = vst [vmem:[#allocation19_spill] sm:$0xff] %v2049_v34  ;;  %v3016_v34 = vperm.slane %v1785_v42, 3  ;;  %vm2116_vm13 = vcmp.lt.f32.partialorder %v3028_v38, %v1792_v46  ;;  %vm2123_vm12 = vcmp.lt.f32.partialorder %v3031_v30, %v1792_v46  ;;  %v3038_v38 = vperm.slane %v1788_v43, 0 }
  0xa0   : > { %3015 = vst [vmem:[#allocation20_spill] sm:$0xff] %v2082_v61  ;;  %v3030_v39 = vsel %vm2116_vm13, 4294967295, %v3029_v39  ;;  %v3036_v61 = vperm.slane %v1785_v42, 7  ;;  %v3040_v46 = vperm.slane %v1768_v29, 7  ;;  %v3049_v29 = vperm.slane %v1743_v10, 4 }
  0xa1   : > { %v2087_v33 = vadd.f32 %v3016_v34, %v1810_v63  ;;  %3019 = vst [vmem:[#allocation22_spill] sm:$0xff] %v2092_v57  ;;  %v3025_v34 = vperm.slane %v1743_v10, 1  ;;  %v2140_v52 = vadd.f32 %v3038_v38, %v1810_v63  ;;  %v3054_v38 = vmov 0 }
  0xa2   : > { %3021 = vst [vmem:[#allocation23_spill] sm:$0xff] %v2097_v32  ;;  %v3032_v32 = vmov 0  ;;  %v2135_v28 = vadd.f32 %v3036_v61, %v1810_v63  ;;  %v2145_v30 = vsub.f32 %v1758_v21, %v3040_v46  ;;  %v3045_v61 = vperm.slane %v1743_v10, 3 }
  0xa3   : > { %3017 = vst [vmem:[#allocation21_spill] sm:$0xff] %v2087_v33  ;;  %vm2109_vm14 = vcmp.lt.f32.partialorder %v3025_v34, %v1953_v22  ;;  %v3026_v33 = vmov 0  ;;  %v3033_v32 = vsel %vm2123_vm12, 4294967295, %v3032_v32  ;;  %v3034_v34 = vperm.slane %v1785_v42, 6 }
  0xa4   : > { %v3027_v33 = vsel %vm2109_vm14, 4294967295, %v3026_v33  ;;  %3037 = vst [vmem:[#allocation25_spill] sm:$0xff] %v2135_v28  ;;  %vm2150_vm14 = vcmp.lt.f32.partialorder %v3041_v13, %v1953_v22  ;;  %vm2157_vm15 = vcmp.lt.f32.partialorder %v3045_v61, %v1953_v22  ;;  %v3046_v28 = vmov 0 }
  0xa5   : > { %v2130_v57 = vadd.f32 %v3034_v34, %v1810_v63  ;;  %3039 = vst [vmem:[#allocation26_spill] sm:$0xff] %v2140_v52  ;;  %v3042_v34 = vmov 0  ;;  %v3047_v28 = vsel %vm2157_vm15, 4294967295, %v3046_v28  ;;  %vm2164_vm12 = vcmp.lt.f32.partialorder %v3049_v29, %v1953_v22 }
  0xa6   : > { %v3043_v34 = vsel %vm2150_vm14, 4294967295, %v3042_v34  ;;  %3048 = vst [vmem:[#allocation28_spill] sm:$0xff] %v3047_v28  ;;  %v3050_v63 = vmov 0  ;;  %v3053_v13 = vperm.slane %v1743_v10, 5  ;;  %v3057_v46 = vperm.slane %v1778_v37, 0 }
  0xa7   : > { %3035 = vst [vmem:[#allocation24_spill] sm:$0xff] %v2130_v57  ;;  %v3051_v63 = vsel %vm2164_vm12, 4294967295, %v3050_v63  ;;  %v3058_v52 = vperm.slane %v1778_v37, 1  ;;  %v3059_v29 = vperm.slane %v1778_v37, 2  ;;  %v3106_v28 = vmov 0 }
  0xa8   : > { %3044 = vst [vmem:[#allocation27_spill] sm:$0xff] %v3043_v34  ;;  %vm2171_vm13 = vcmp.lt.f32.partialorder %v3053_v13, %v1953_v22  ;;  %v2178_v61 = vsub.f32 %v1758_v21, %v3057_v46  ;;  %v3060_v13 = vperm.slane %v1778_v37, 3  ;;  %v3062_v46 = vmov 0 }
  0xa9   : > { %3052 = vst [vmem:[#allocation29_spill] sm:$0xff] %v3051_v63  ;;  %v3055_v38 = vsel %vm2171_vm13, 4294967295, %v3054_v38  ;;  %v2183_v57 = vsub.f32 %v1758_v21, %v3058_v52  ;;  %v2188_v27 = vsub.f32 %v1758_v21, %v3059_v29  ;;  %vm2198_vm13 = vcmp.lt.f32.partialorder %v3061_v24, %v1953_v22 }
  0xaa   : > { %3056 = vst [vmem:[#allocation30_spill] sm:$0xff] %v3055_v38  ;;  %v2193_v25 = vsub.f32 %v1758_v21, %v3060_v13  ;;  %v3063_v46 = vsel %vm2198_vm13, 4294967295, %v3062_v46  ;;  %v3065_v52 = vperm.slane %v1743_v10, 7  ;;  %v3069_v29 = vperm.slane %v1745_v11, 0 }
  0xab   : > { %3064 = vst [vmem:[#allocation31_spill] sm:$0xff] %v3063_v46  ;;  %v3070_v13 = vmov 0  ;;  %v3073_v24 = vperm.slane %v1745_v11, 1  ;;  %v3077_v10 = vperm.slane %v1778_v37, 4  ;;  %v3122_v34 = vmov 0 }
  0xac   : > { %vm2205_vm12 = vcmp.lt.f32.partialorder %v3065_v52, %v1953_v22  ;;  %vm2212_vm15 = vcmp.lt.f32.partialorder %v3069_v29, %v1953_v22  ;;  %v3079_v29 = vperm.slane %v1778_v37, 6  ;;  %v624_v16 = vsel %vm1917_vm8, %v2178_v61, 0.0  ;;  %v3179_v61 = vld [vmem:[#allocation11_spill] sm:$0xff] }
  0xad   : > { %v3067_v23 = vsel %vm2205_vm12, 4294967295, %v3066_v23  ;;  %v3071_v13 = vsel %vm2212_vm15, 4294967295, %v3070_v13  ;;  %vm2219_vm14 = vcmp.lt.f32.partialorder %v3073_v24, %v1953_v22  ;;  %v2226_v52 = vsub.f32 %v1758_v21, %v3077_v10 }
  0xae   : > { %3068 = vst [vmem:[#allocation32_spill] sm:$0xff] %v3067_v23  ;;  %v3075_v50 = vsel %vm2219_vm14, 4294967295, %v3074_v50  ;;  %v3078_v23 = vperm.slane %v1778_v37, 5  ;;  %v3080_v24 = vperm.slane %v1778_v37, 7  ;;  %v3082_v10 = vmov 0 }
  0xaf   : > { %3072 = vst [vmem:[#allocation33_spill] sm:$0xff] %v3071_v13  ;;  %v2236_v13 = vsub.f32 %v1758_v21, %v3079_v29  ;;  %v3089_v37 = vperm.slane %v1745_v11, 4  ;;  %v3090_v29 = vmov 0  ;;  %v625_v40 = vsel %vm1924_vm9, %v2183_v57, 0.0 }
  0xb0   : > { %3076 = vst [vmem:[#allocation34_spill] sm:$0xff] %v3075_v50  ;;  %v2231_v46 = vsub.f32 %v1758_v21, %v3078_v23  ;;  %v2241_v38 = vsub.f32 %v1758_v21, %v3080_v24  ;;  %v3081_v50 = vperm.slane %v1745_v11, 2  ;;  %v3085_v23 = vperm.slane %v1745_v11, 3  ;;  %v3165_v47 = vld [vmem:[#allocation29_spill] sm:$0xff] }
  0xb1   : > { %vm2260_vm12 = vcmp.lt.f32.partialorder %v3089_v37, %v1953_v22  ;;  %v3094_v24 = vmov 0  ;;  %v3099_v37 = vperm.slane %v1785_v42, 2  ;;  %v626_v17 = vsel %vm1931_vm10, %v2188_v27, 0.0  ;;  %v3168_v51 = vld [vmem:[#allocation30_spill] sm:$0xff] }
  0xb2   : > { %vm2246_vm14 = vcmp.lt.f32.partialorder %v3081_v50, %v1953_v22  ;;  %vm2253_vm15 = vcmp.lt.f32.partialorder %v3085_v23, %v1953_v22  ;;  %v3091_v29 = vsel %vm2260_vm12, 4294967295, %v3090_v29  ;;  %v3093_v50 = vperm.slane %v1745_v11, 5 }
  0xb3   : > { %v3083_v10 = vsel %vm2246_vm14, 4294967295, %v3082_v10  ;;  %v3087_v19 = vsel %vm2253_vm15, 4294967295, %v3086_v19  ;;  %3092 = vst [vmem:[#allocation37_spill] sm:$0xff] %v3091_v29  ;;  %v2284_v29 = vsub.f32 %v1758_v21, %v3099_v37  ;;  %v3109_v37 = vperm.slane %v1747_v12, 0 }
  0xb4   : > { %3084 = vst [vmem:[#allocation35_spill] sm:$0xff] %v3083_v10  ;;  %vm2267_vm13 = vcmp.lt.f32.partialorder %v3093_v50, %v1953_v22  ;;  %v3097_v10 = vperm.slane %v1785_v42, 0  ;;  %v3100_v50 = vperm.slane %v1785_v42, 3  ;;  %v631_v27 = vsel %vm3146_vm3, %v2241_v38, 0.0 }
  0xb5   : > { %3088 = vst [vmem:[#allocation36_spill] sm:$0xff] %v3087_v19  ;;  %v3095_v24 = vsel %vm2267_vm13, 4294967295, %v3094_v24  ;;  %v3098_v19 = vperm.slane %v1785_v42, 1  ;;  %vm2308_vm15 = vcmp.lt.f32.partialorder %v3109_v37, %v1953_v22  ;;  %v3119_v37 = vperm.slane %v1785_v42, 6 }
  0xb6   : > { %3096 = vst [vmem:[#allocation38_spill] sm:$0xff] %v3095_v24  ;;  %v2274_v23 = vsub.f32 %v1758_v21, %v3097_v10  ;;  %v2289_v0 = vsub.f32 %v1758_v21, %v3100_v50  ;;  %v3101_v24 = vperm.slane %v1745_v11, 6  ;;  %v3102_v10 = vmov 0 }
  0xb7   : > { %v2279_v63 = vsub.f32 %v1758_v21, %v3098_v19  ;;  %v3105_v19 = vperm.slane %v1745_v11, 7  ;;  %v3110_v50 = vmov 0  ;;  %v3117_v11 = vperm.slane %v1785_v42, 4 }
  0xb8   : > { %vm2294_vm13 = vcmp.lt.f32.partialorder %v3101_v24, %v1953_v22  ;;  %v3111_v50 = vsel %vm2308_vm15, 4294967295, %v3110_v50  ;;  %v3113_v24 = vperm.slane %v1747_v12, 1  ;;  %vm3151_vm8 = vnez %v3009_v60 }
  0xb9   : > { %v3103_v10 = vsel %vm2294_vm13, 4294967295, %v3102_v10  ;;  %vm2301_vm12 = vcmp.lt.f32.partialorder %v3105_v19, %v1953_v22  ;;  %3112 = vst [vmem:[#allocation41_spill] sm:$0xff] %v3111_v50  ;;  %v2322_v19 = vsub.f32 %v1758_v21, %v3117_v11  ;;  %v2332_v50 = vsub.f32 %v1758_v21, %v3119_v37 }
  0xba   : > { %3104 = vst [vmem:[#allocation39_spill] sm:$0xff] %v3103_v10  ;;  %v3107_v28 = vsel %vm2301_vm12, 4294967295, %v3106_v28  ;;  %vm2315_vm14 = vcmp.lt.f32.partialorder %v3113_v24, %v1953_v22  ;;  %v3120_v24 = vperm.slane %v1785_v42, 7  ;;  %v3121_v11 = vperm.slane %v1747_v12, 2 }
  0xbb   : > { %3108 = vst [vmem:[#allocation40_spill] sm:$0xff] %v3107_v28  ;;  %v3115_v18 = vsel %vm2315_vm14, 4294967295, %v3114_v18  ;;  %v3118_v28 = vperm.slane %v1785_v42, 5  ;;  %v3129_v42 = vperm.slane %v1747_v12, 4  ;;  %v3130_v37 = vmov 0 }
  0xbc   : > { %3116 = vst [vmem:[#allocation42_spill] sm:$0xff] %v3115_v18  ;;  %v2337_v18 = vsub.f32 %v1758_v21, %v3120_v24  ;;  %vm2342_vm14 = vcmp.lt.f32.partialorder %v3121_v11, %v1953_v22  ;;  %v3132_v24 = vperm.slane %v1747_v12, 5  ;;  %v3133_v11 = vmov 0 }
  0xbd   : > { %v2327_v10 = vsub.f32 %v1758_v21, %v3118_v28  ;;  %v3123_v34 = vsel %vm2342_vm14, 4294967295, %v3122_v34  ;;  %v3125_v28 = vperm.slane %v1747_v12, 3  ;;  %vm2356_vm12 = vcmp.lt.f32.partialorder %v3129_v42, %v1953_v22 }
  0xbe   : > { %3124 = vst [vmem:[#allocation43_spill] sm:$0xff] %v3123_v34  ;;  %v3131_v37 = vsel %vm2356_vm12, 4294967295, %v3130_v37  ;;  %vm2363_vm13 = vcmp.lt.f32.partialorder %v3132_v24, %v1953_v22  ;;  %v3136_v34 = vperm.slane %v1788_v43, 0  ;;  %v617_v42 = vsel %vm1844_vm1, %v1823_v8, 0.0 }
  0xbf   : > { %vm2349_vm15 = vcmp.lt.f32.partialorder %v3125_v28, %v1953_v22  ;;  %v3134_v11 = vsel %vm2363_vm13, 4294967295, %v3133_v11  ;;  %v618_v24 = vsel %vm1851_vm2, %v1826_v9, 0.0  ;;  %v623_v8 = vsel %vm1910_vm7, %v2145_v30, 0.0  ;;  %v3162_v9 = vld [vmem:[#allocation28_spill] sm:$0xff] }
  0xc0   : > { %v3127_v1 = vsel %vm2349_vm15, 4294967295, %v3126_v1  ;;  %3135 = vst [vmem:[#allocation45_spill] sm:$0xff] %v3134_v11  ;;  %v2370_v28 = vsub.f32 %v1758_v21, %v3136_v34  ;;  %v3137_v11 = vperm.slane %v1747_v12, 6  ;;  %v3140_v21 = vperm.slane %v1747_v12, 7  ;;  %v3176_v34 = vld [vmem:[#allocation10_spill] sm:$0xff] }
  0xc1   : > { %3128 = vst [vmem:[#allocation44_spill] sm:$0xff] %v3127_v1  ;;  %v616_v1 = vsel %vm1837_vm0, %v1820_v7, 0.0  ;;  %v621_v7 = vsel %vm1884_vm5, %v1862_v2, 0.0  ;;  %v622_v12 = vsel %vm1891_vm6, %v1865_v15, 0.0  ;;  %v627_v15 = vsel %vm1958_vm11, %v2193_v25, 0.0 }
  0xc2   : > { %vm2384_vm13 = vcmp.lt.f32.partialorder %v3137_v11, %v1953_v22  ;;  %vm2391_vm12 = vcmp.lt.f32.partialorder %v3140_v21, %v1953_v22  ;;  %vm3143_vm0 = vnez %v2985_v53  ;;  %vm3144_vm1 = vnez %v2987_v54  ;;  %v3188_v11 = vld [vmem:[#allocation14_spill] sm:$0xff]  ;;  %v3191_v21 = vld [vmem:[#allocation15_spill] sm:$0xff] }
  0xc3   : > { %v628_v20 = vsel %vm3143_vm0, %v2226_v52, 0.0  ;;  %v629_v41 = vsel %vm3144_vm1, %v2231_v46, 0.0  ;;  %vm3145_vm2 = vnez %v2989_v26  ;;  %v632_v25 = vsel %vm3147_vm4, %v2274_v23, 0.0  ;;  %v3180_v46 = vld [vmem:[#allocation34_spill] sm:$0xff]  ;;  %v3182_v52 = vld [vmem:[#allocation12_spill] sm:$0xff] }
  0xc4   : > { %v630_v57 = vsel %vm3145_vm2, %v2236_v13, 0.0  ;;  %vm3148_vm5 = vnez %v2999_v58  ;;  %vm3149_vm6 = vnez %v3001_v31  ;;  %vm3150_vm7 = vnez %v3007_v59 }
  0xc5   : > { %v633_v53 = vsel %vm3148_vm5, %v2279_v63, 0.0  ;;  %v634_v54 = vsel %vm3149_vm6, %v2284_v29, 0.0  ;;  %v635_v26 = vsel %vm3150_vm7, %v2289_v0, 0.0  ;;  %v636_v55 = vsel %vm3151_vm8, %v2322_v19, 0.0  ;;  %v3159_v0 = vld [vmem:[#allocation27_spill] sm:$0xff]  ;;  %v3177_v63 = vld [vmem:[#allocation33_spill] sm:$0xff] }
  0xc6   : > { %vm3152_vm9 = vnez %v3011_v62  ;;  %vm3153_vm10 = vnez %v3013_v35  ;;  %vm715_vm11 = vcmask 1041408   ;;  %vm717_vm0 = vcmask 1045508   ;;  %v3158_v62 = vld [vmem:[#allocation4_spill] sm:$0xff]  ;;  %v3183_v29 = vld [vmem:[#allocation35_spill] sm:$0xff] }
  0xc7   : > { %v637_v56 = vsel %vm3152_vm9, %v2327_v10, 0.0  ;;  %v638_v58 = vsel %vm3153_vm10, %v2332_v50, 0.0  ;;  %vm3154_vm1 = vnez %v3030_v39  ;;  %vm3155_vm2 = vnez %v3033_v32  ;;  %v3174_v39 = vld [vmem:[#allocation32_spill] sm:$0xff]  ;;  %v3185_v10 = vld [vmem:[#allocation13_spill] sm:$0xff] }
  0xc8   : > { %v639_v31 = vsel %vm3154_vm1, %v2337_v18, 0.0  ;;  %v640_v59 = vsel %vm3155_vm2, %v2370_v28, 0.0  ;;  %vm3156_vm3 = vnez %v3024_v36  ;;  %vm3157_vm4 = vnez %v3027_v33  ;;  %v3161_v18 = vld [vmem:[#allocation5_spill] sm:$0xff]  ;;  %v3171_v33 = vld [vmem:[#allocation31_spill] sm:$0xff]  ;;  %v3186_v50 = vld [vmem:[#allocation36_spill] sm:$0xff] }
  0xc9   : > { %v641_v60 = vsel %vm3156_vm3, %v1856_v3, %v616_v1  ;;  %v642_v35 = vsel %vm3157_vm4, %v1859_v14, %v617_v42  ;;  %vm719_vm5 = vcmask 1043456   ;;  %vm3160_vm6 = vnez %v3159_v0  ;;  %v3170_v3 = vld [vmem:[#allocation8_spill] sm:$0xff]  ;;  %v3173_v36 = vld [vmem:[#allocation9_spill] sm:$0xff]  ;;  %v3203_v0 = vld [vmem:[#allocation19_spill] sm:$0xff] }
  0xca   : > { %v643_v2 = vsel %vm3160_vm6, %v3158_v62, %v618_v24  ;;  %vm3163_vm7 = vnez %v3162_v9  ;;  %vm3166_vm8 = vnez %v3165_v47  ;;  %vm3169_vm9 = vnez %v3168_v51  ;;  %v3189_v42 = vld [vmem:[#allocation37_spill] sm:$0xff]  ;;  %v3206_v9 = vld [vmem:[#allocation3_spill] sm:$0xff] }
  0xcb   : > { %v644_v44 = vsel %vm3163_vm7, %v3161_v18, %v619_v5  ;;  %v645_v48 = vsel %vm3166_vm8, %v3164_v45, %v620_v4  ;;  %v646_v1 = vsel %vm3169_vm9, %v3167_v49, %v621_v7  ;;  %vm3172_vm10 = vnez %v3171_v33  ;;  %v3192_v5 = vld [vmem:[#allocation38_spill] sm:$0xff]  ;;  %v3194_v7 = vld [vmem:[#allocation16_spill] sm:$0xff]  ;;  %v3201_v62 = vld [vmem:[#allocation41_spill] sm:$0xff] }
  0xcc   : > { %v647_v14 = vsel %vm3172_vm10, %v3170_v3, %v622_v12  ;;  %vm3175_vm1 = vnez %v3174_v39  ;;  %vm3178_vm3 = vnez %v3177_v63  ;;  %vm3181_vm4 = vnez %v3180_v46  ;;  %v3195_v12 = vld [vmem:[#allocation39_spill] sm:$0xff]  ;;  %v3204_v18 = vld [vmem:[#allocation42_spill] sm:$0xff]  ;;  %v3212_v51 = vld [vmem:[#allocation21_spill] sm:$0xff] }
  0xcd   : > { %v648_v30 = vsel %vm3175_vm1, %v3173_v36, %v623_v8  ;;  %v649_v38 = vsel %vm3178_vm3, %v3176_v34, %v624_v16  ;;  %v650_v13 = vsel %vm3181_vm4, %v3179_v61, %v625_v40  ;;  %vm3184_vm6 = vnez %v3183_v29  ;;  %v3197_v16 = vld [vmem:[#allocation17_spill] sm:$0xff]  ;;  %v3198_v40 = vld [vmem:[#allocation40_spill] sm:$0xff]  ;;  %v3216_v36 = vld [vmem:[#allocation23_spill] sm:$0xff] }
  0xce   : > { %v651_v23 = vsel %vm3184_vm6, %v3182_v52, %v626_v17  ;;  %vm3187_vm7 = vnez %v3186_v50  ;;  %vm3190_vm8 = vnez %v3189_v42  ;;  %vm3193_vm9 = vnez %v3192_v5  ;;  %v3217_v39 = vld [vmem:[#allocation45_spill] sm:$0xff]  ;;  %v3219_v34 = vld [vmem:[#allocation24_spill] sm:$0xff] }
  0xcf   : > { %v652_v19 = vsel %vm3187_vm7, %v3185_v10, %v627_v15  ;;  %v653_v24 = vsel %vm3190_vm8, %v3188_v11, %v628_v20  ;;  %v654_v4 = vsel %vm3193_vm9, %v3191_v21, %v629_v41  ;;  %vm3196_vm10 = vnez %v3195_v12  ;;  %v3200_v15 = vld [vmem:[#allocation18_spill] sm:$0xff]  ;;  %v3220_v61 = vld [vmem:[#allocation25_spill] sm:$0xff]  ;;  %v672_v49 = vld [vmem:[%s358_s16 + $0x30] sm:$0x3] }
  0xd0   : > { %v655_v8 = vsel %vm3196_vm10, %v3194_v7, %v630_v57  ;;  %vm3199_vm1 = vnez %v3198_v40  ;;  %vm3202_vm3 = vnez %v3201_v62  ;;  %vm3205_vm4 = vnez %v3204_v18  ;;  %v3210_v57 = vld [vmem:[#allocation20_spill] sm:$0xff] }
  0xd1   : > { %v656_v17 = vsel %vm3199_vm1, %v3197_v16, %v631_v27  ;;  %v657_v20 = vsel %vm3202_vm3, %v3200_v15, %v632_v25  ;;  %v658_v41 = vsel %vm3205_vm4, %v3203_v0, %v633_v53  ;;  %v3207_v45 = vperm.slane %v3206_v9, 0  ;;  %v3214_v25 = vld [vmem:[#allocation22_spill] sm:$0xff]  ;;  %v668_v12 = vld [vmem:[%s358_s16 + $0x10] sm:$0xff]  ;;  %v671_v18 = vld [vmem:[%s358_s16 + $0x28] sm:$0xff] }
  0xd2   : > { %v659_v27 = vsel %vm2342_vm14, %v3210_v57, %v634_v54  ;;  %v660_v33 = vsel %vm2349_vm15, %v3212_v51, %v635_v26  ;;  %vm3215_vm7 = vnez %v3131_v37  ;;  %vm3218_vm8 = vnez %v3217_v39 }
  0xd3   : > { %vm2527_vm6 = vcmp.lt.f32.partialorder %v3207_v45, %v1953_v22  ;;  %v661_v53 = vsel %vm3215_vm7, %v3214_v25, %v636_v55  ;;  %v662_v22 = vsel %vm3218_vm8, %v3216_v36, %v637_v56  ;;  %v663_v63 = vsel %vm2384_vm13, %v3219_v34, %v638_v58 }
  0xd4   : > { %v664_v54 = vsel %vm2391_vm12, %v3220_v61, %v639_v31  ;;  %v697_v46 = vrot.slane %v642_v35, 6  ;;  %v698_v52 = vrot.slane %v643_v2, 4  ;;  %v699_v26 = vrot.slane %v644_v44, 2 }
  0xd5   : > { %v700_v29 = vrot.slane %v646_v1, 6  ;;  %v701_v10 = vrot.slane %v647_v14, 4  ;;  %v702_v37 = vrot.slane %v648_v30, 2  ;;  %v703_v55 = vrot.slane %v650_v13, 6  ;;  %v666_v14 = vld [vmem:[%s358_s16] sm:$0xff]  ;;  %v667_v30 = vld [vmem:[%s358_s16 + $0x8] sm:$0xff] }
  0xd6   : > { %v704_v50 = vrot.slane %v651_v23, 4  ;;  %v705_v11 = vrot.slane %v652_v19, 2  ;;  %v706_v42 = vrot.slane %v654_v4, 6  ;;  %v707_v56 = vrot.slane %v655_v8, 4  ;;  %v669_v8 = vld [vmem:[%s358_s16 + $0x18] sm:$0xff] }
  0xd7   : > { %v708_v21 = vrot.slane %v656_v17, 2  ;;  %v709_v43 = vrot.slane %v658_v41, 6  ;;  %v710_v58 = vrot.slane %v659_v27, 4  ;;  %v711_v5 = vrot.slane %v660_v33, 2  ;;  %v670_v17 = vld [vmem:[%s358_s16 + $0x20] sm:$0xff] }
  0xd8   : > { %v712_v7 = vrot.slane %v662_v22, 6  ;;  %v713_v6 = vrot.slane %v663_v63, 4  ;;  %v714_v31 = vrot.slane %v664_v54, 2  ;;  %v716_v35 = vsel %vm715_vm11, %v641_v60, %v697_v46 }
  0xd9   : > { %v718_v2 = vsel %vm717_vm0, %v698_v52, %v699_v26  ;;  %v721_v44 = vsel %vm715_vm11, %v645_v48, %v700_v29  ;;  %v722_v1 = vsel %vm717_vm0, %v701_v10, %v702_v37  ;;  %v724_v19 = vsel %vm715_vm11, %v649_v38, %v703_v55 }
  0xda   : > { %v720_v13 = vsel %vm719_vm5, %v716_v35, %v718_v2  ;;  %v723_v23 = vsel %vm719_vm5, %v721_v44, %v722_v1  ;;  %v725_v4 = vsel %vm717_vm0, %v704_v50, %v705_v11  ;;  %v727_v16 = vsel %vm715_vm11, %v653_v24, %v706_v42 }
  0xdb   : > { %v726_v60 = vsel %vm719_vm5, %v724_v19, %v725_v4  ;;  %v728_v48 = vsel %vm717_vm0, %v707_v56, %v708_v21  ;;  %v730_v40 = vsel %vm715_vm11, %v657_v20, %v709_v43  ;;  %v731_v62 = vsel %vm717_vm0, %v710_v58, %v711_v5  ;;  %v3221_v20 = vld [vmem:[#allocation26_spill] sm:$0xff] }
  0xdc   : > { %v729_v15 = vsel %vm719_vm5, %v727_v16, %v728_v48  ;;  %v733_v0 = vsel %vm715_vm11, %v661_v53, %v712_v7  ;;  %v734_v38 = vsel %vm717_vm0, %v713_v6, %v714_v31  ;;  %v732_v41 = vsel %vm719_vm5, %v730_v40, %v731_v62 }
  0xdd   : > { %v735_v9 = vsel %vm719_vm5, %v733_v0, %v734_v38  ;;  %v742_v45 = vmul.f32 %v720_v13, %v666_v14  ;;  %v743_v24 = vmul.f32 %v723_v23, %v667_v30  ;;  %v665_v57 = vsel %vm2527_vm6, %v3221_v20, %v640_v59 }
  0xde   : > { %v744_v27 = vmul.f32 %v726_v60, %v668_v12  ;;  %v745_v51 = vmul.f32 %v729_v15, %v669_v8  ;;  %v746_v3 = vmul.f32 %v732_v41, %v670_v17  ;;  %v747_v32 = vmul.f32 %v735_v9, %v671_v18 }
  0xdf   : > { %749 = vst [vmem:[%s2579_s17] sm:$0xff] %v742_v45  ;;  %v748_v28 = vmul.f32 %v672_v49, %v665_v57 }
  0xe0   : > { %750 = vst [vmem:[%s2579_s17 + $0x8] sm:$0xff] %v743_v24 }
  0xe1   : > { %751 = vst [vmem:[%s2579_s17 + $0x10] sm:$0xff] %v744_v27  ;;  %762 = sbr.rel (!%p1707_p3) target bundleno = 378 (0x17a), region = 48 }
  0xe2   : > { %752 = vst [vmem:[%s2579_s17 + $0x18] sm:$0xff] %v745_v51 }
  0xe3   : > { %753 = vst [vmem:[%s2579_s17 + $0x20] sm:$0xff] %v746_v3 }
  0xe4   : > { %754 = vst [vmem:[%s2579_s17 + $0x28] sm:$0xff] %v747_v32 }
  0xe5   : > { %755 = vst [vmem:[%s2579_s17 + $0x30] sm:$0x3] %v748_v28 }
  0xe6   : > { %s3241_s18 = smov (!%p765_p9, %s764_s18), 25 }
  0xe7   : > { %s2597_s30 = sshll.u32 %s3241_s18, 1 }
  0xe8   : > { %p1265_p10 = scmp.eq.s32.totalorder %s2597_s30, 0 }
  0xe9   : > { %p777_p11 = scmp.lt.u32.totalorder (!%p1265_p10), %s2597_s30, 8 }
  0xea   : > { %776 = sbr.rel (%p1265_p10) target bundleno = 378 (0x17a), region = 52 }
  0xef   : > { %780 = sbr.rel (%p777_p11) target bundleno = 369 (0x171), region = 56  ;;  %s2602_s29 = sand.u32 (!%p777_p11), 7, %s2597_s30  }
  0xf0   : > { %p797_p12 = scmp.eq.s32.totalorder (!%p777_p11), %s2602_s29, 0  ;;  %p1266_p13 = scmp.ne.s32.totalorder (!%p777_p11), %s2602_s29, 0 }
  0xf4   : > { %800 = sbr.rel (%p1266_p13) target bundleno = 304 (0x130), region = 71  ;;  %s801_s23 = sshrl.u32 (!%p1266_p13), %s2597_s30, 3 }
  0xf5   : > { %s2609_s8 = sshrl.u32 (!%p1266_p13), %s801_s23, 5 }
  0xf6   : > { %p1267_p0 = scmp.le.s32.totalorder (!%p1266_p13), %s2609_s8, 0 }
  0xf9   : > { %1134 = sbr.rel (%p1267_p0) target bundleno = 287 (0x11f), region = 164  ;;  %s3222_s9 = smov (!%p1267_p0), %s2595_s28 }
  0xfa   : > { %s3223_s10 = smov (!%p1267_p0), %s2579_s17  ;;  %s2618_s11 = smov (!%p1267_p0), 0  }
  0xfb   : > { %s2620_s12 = smov (!%p1267_p0), 0  }
  0xfe LB: >> { %v812_v59 = vld [vmem:[%s1579_s10] sm:$0xff]  ;;  %v814_v47 = vld [vmem:[%s1579_s10 + $0x8] sm:$0xff]  ;;  %v816_v33 = vld [vmem:[%s1579_s10 + $0x10] sm:$0xff]  ;;  %s876_s13 = sadd.s32 1, %s1583_s11  ;;  %s806_s12 = sadd.s32 1, %s1587_s12   ;;  %s1587_s12 = sphi %s2620_s12, %s806_s12   ;;  %s1583_s11 = sphi %s2618_s11, %s3226_s11   ;;  %s1579_s10 = sphi %s3223_s10, %s3225_s10   ;;  %s1575_s9 = sphi %s3222_s9, %s3224_s9  }
  0xff   : >> { %813 = vst [vmem:[%s1575_s9] sm:$0xff] %v812_v59  ;;  %v818_v25 = vld [vmem:[%s1579_s10 + $0x18] sm:$0xff]  ;;  %p877_p1 = scmp.ge.s32.totalorder %s876_s13, %s2609_s8  ;;  %v820_v53 = vld [vmem:[%s1579_s10 + $0x20] sm:$0xff]  ;;  %v822_v36 = vld [vmem:[%s1579_s10 + $0x28] sm:$0xff]  ;;  %p805_p2 = scmp.ge.s32.totalorder %s806_s12, %s2609_s8 }
 0x100   : >> { %815 = vst [vmem:[%s1575_s9 + $0x8] sm:$0xff] %v814_v47  ;;  %v824_v39 = vld [vmem:[%s1579_s10 + $0x30] sm:$0xff]  ;;  %v826_v22 = vld [vmem:[%s1579_s10 + $0x38] sm:$0xff]  ;;  %v828_v34 = vld [vmem:[%s1579_s10 + $0x40] sm:$0xff] }
 0x101   : >> { %817 = vst [vmem:[%s1575_s9 + $0x10] sm:$0xff] %v816_v33  ;;  %s3243_s13 = smov (%p877_p1, %s876_s13), 0  ;;  %v830_v63 = vld [vmem:[%s1579_s10 + $0x48] sm:$0xff]  ;;  %v832_v61 = vld [vmem:[%s1579_s10 + $0x50] sm:$0xff]  ;;  %v834_v54 = vld [vmem:[%s1579_s10 + $0x58] sm:$0xff] }
 0x102   : >> { %819 = vst [vmem:[%s1575_s9 + $0x18] sm:$0xff] %v818_v25  ;;  %s1268_s14 = sshll.u32 %s3243_s13, 8  ;;  %v836_v46 = vld [vmem:[%s1579_s10 + $0x60] sm:$0xff]  ;;  %v838_v52 = vld [vmem:[%s1579_s10 + $0x68] sm:$0xff]  ;;  %v840_v26 = vld [vmem:[%s1579_s10 + $0x70] sm:$0xff]  ;;  %s3226_s11 = smov %s3243_s13 }
 0x103   : >> { %821 = vst [vmem:[%s1575_s9 + $0x20] sm:$0xff] %v820_v53  ;;  %s2652_s15 = scalar_lea.vmem %s2579_s17, %s1268_s14 [#allocation2]   ;;  %s2655_s16 = scalar_lea.vmem %s2595_s28, %s1268_s14   ;;  %v842_v29 = vld [vmem:[%s1579_s10 + $0x78] sm:$0xff]  ;;  %v844_v10 = vld [vmem:[%s1579_s10 + $0x80] sm:$0xff]  ;;  %v846_v37 = vld [vmem:[%s1579_s10 + $0x88] sm:$0xff] }
 0x104   : >> { %823 = vst [vmem:[%s1575_s9 + $0x28] sm:$0xff] %v822_v36  ;;  %v848_v55 = vld [vmem:[%s1579_s10 + $0x90] sm:$0xff]  ;;  %v850_v50 = vld [vmem:[%s1579_s10 + $0x98] sm:$0xff]  ;;  %v852_v11 = vld [vmem:[%s1579_s10 + $0xa0] sm:$0xff] }
 0x105   : >> { %825 = vst [vmem:[%s1575_s9 + $0x30] sm:$0xff] %v824_v39  ;;  %v854_v42 = vld [vmem:[%s1579_s10 + $0xa8] sm:$0xff]  ;;  %v856_v56 = vld [vmem:[%s1579_s10 + $0xb0] sm:$0xff]  ;;  %v858_v21 = vld [vmem:[%s1579_s10 + $0xb8] sm:$0xff] }
 0x106   : >> { %827 = vst [vmem:[%s1575_s9 + $0x38] sm:$0xff] %v826_v22  ;;  %v860_v43 = vld [vmem:[%s1579_s10 + $0xc0] sm:$0xff]  ;;  %v862_v58 = vld [vmem:[%s1579_s10 + $0xc8] sm:$0xff]  ;;  %v864_v5 = vld [vmem:[%s1579_s10 + $0xd0] sm:$0xff] }
 0x107   : >> { %829 = vst [vmem:[%s1575_s9 + $0x40] sm:$0xff] %v828_v34  ;;  %v866_v7 = vld [vmem:[%s1579_s10 + $0xd8] sm:$0xff]  ;;  %v868_v6 = vld [vmem:[%s1579_s10 + $0xe0] sm:$0xff]  ;;  %v870_v31 = vld [vmem:[%s1579_s10 + $0xe8] sm:$0xff] }
 0x108   : >> { %831 = vst [vmem:[%s1575_s9 + $0x48] sm:$0xff] %v830_v63  ;;  %v872_v35 = vld [vmem:[%s1579_s10 + $0xf0] sm:$0xff]  ;;  %v874_v2 = vld [vmem:[%s1579_s10 + $0xf8] sm:$0xff]  ;;  %s3225_s10 = smov %s2652_s15 }
 0x109   : >> { %833 = vst [vmem:[%s1575_s9 + $0x50] sm:$0xff] %v832_v61 }
 0x10a   : >> { %835 = vst [vmem:[%s1575_s9 + $0x58] sm:$0xff] %v834_v54 }
 0x10b   : >> { %837 = vst [vmem:[%s1575_s9 + $0x60] sm:$0xff] %v836_v46 }
 0x10c   : >> { %839 = vst [vmem:[%s1575_s9 + $0x68] sm:$0xff] %v838_v52 }
 0x10d   : >> { %841 = vst [vmem:[%s1575_s9 + $0x70] sm:$0xff] %v840_v26 }
 0x10e   : >> { %843 = vst [vmem:[%s1575_s9 + $0x78] sm:$0xff] %v842_v29 }
 0x10f   : >> { %845 = vst [vmem:[%s1575_s9 + $0x80] sm:$0xff] %v844_v10 }
 0x110   : >> { %847 = vst [vmem:[%s1575_s9 + $0x88] sm:$0xff] %v846_v37 }
 0x111   : >> { %849 = vst [vmem:[%s1575_s9 + $0x90] sm:$0xff] %v848_v55 }
 0x112   : >> { %851 = vst [vmem:[%s1575_s9 + $0x98] sm:$0xff] %v850_v50 }
 0x113   : >> { %853 = vst [vmem:[%s1575_s9 + $0xa0] sm:$0xff] %v852_v11 }
 0x114   : >> { %855 = vst [vmem:[%s1575_s9 + $0xa8] sm:$0xff] %v854_v42 }
 0x115   : >> { %857 = vst [vmem:[%s1575_s9 + $0xb0] sm:$0xff] %v856_v56 }
 0x116   : >> { %859 = vst [vmem:[%s1575_s9 + $0xb8] sm:$0xff] %v858_v21 }
 0x117   : >> { %861 = vst [vmem:[%s1575_s9 + $0xc0] sm:$0xff] %v860_v43 }
 0x118   : >> { %863 = vst [vmem:[%s1575_s9 + $0xc8] sm:$0xff] %v862_v58 }
 0x119   : >> { %865 = vst [vmem:[%s1575_s9 + $0xd0] sm:$0xff] %v864_v5 }
 0x11a   : >> { %867 = vst [vmem:[%s1575_s9 + $0xd8] sm:$0xff] %v866_v7  ;;  %808 = sbr.rel (!%p805_p2) target bundleno = 254 (0xfe), region = 170 }
 0x11b   : >> { %869 = vst [vmem:[%s1575_s9 + $0xe0] sm:$0xff] %v868_v6 }
 0x11c   : >> { %871 = vst [vmem:[%s1575_s9 + $0xe8] sm:$0xff] %v870_v31 }
 0x11d   : >> { %873 = vst [vmem:[%s1575_s9 + $0xf0] sm:$0xff] %v872_v35 }
 0x11e   : >> { %875 = vst [vmem:[%s1575_s9 + $0xf8] sm:$0xff] %v874_v2  ;;  %s3224_s9 = smov %s2655_s16 }
 0x11f PF: > { %s2721_s21 = sand.u32 31, %s801_s23   ;;  %s1291_s18 = sshll.u32 %s2609_s8, 8 }
 0x120   : > { %s887_s19 = scalar_lea.vmem %s2579_s17, %s1291_s18 [#allocation2]   ;;  %s889_s20 = scalar_lea.vmem %s2595_s28, %s1291_s18  }
 0x121   : > { %p1273_p3 = scmp.le.s32.totalorder %s2721_s21, 0 }
 0x122   : > { %s1589_s26 = smov (!%p1273_p3), %s889_s20   ;;  %s1593_s14 = smov (!%p1273_p3), %s887_s19  }
 0x123   : > { %1148 = sbr.rel (%p1273_p3) target bundleno = 304 (0x130), region = 175  ;;  %s1597_s13 = smov (!%p1273_p3), 0  }
 0x124   : > { %s1601_s15 = smov (!%p1273_p3), 0  }
 0x128 LB: >> { %v899_v44 = vld [vmem:[%s1595_s14] sm:$0xff]  ;;  %s901_s23 = sadd.s32 1, %s1599_s13  ;;  %s893_s15 = sadd.s32 1, %s1603_s15   ;;  %s1603_s15 = sphi %s1601_s15, %s893_s15   ;;  %s1599_s13 = sphi %s1597_s13, %s1598_s13   ;;  %s1595_s14 = sphi %s1593_s14, %s906_s14   ;;  %s1591_s26 = sphi %s1589_s26, %s907_s26  }
 0x129   : >> { %900 = vst [vmem:[%s1591_s26] sm:$0xff] %v899_v44  ;;  %p902_p4 = scmp.ge.s32.totalorder %s901_s23, %s2721_s21  ;;  %p892_p5 = scmp.ge.s32.totalorder %s893_s15, %s2721_s21 }
 0x12b   : >> { %s3245_s23 = smov (%p902_p4, %s901_s23), 0  ;;  %895 = sbr.rel (!%p892_p5) target bundleno = 296 (0x128), region = 181 }
 0x12c   : >> { %s1274_s8 = sshll.u32 %s3245_s23, 3  ;;  %s1598_s13 = smov %s3245_s23  }
 0x12d   : >> { %s906_s14 = scalar_lea.vmem %s887_s19, %s1274_s8 [#allocation2]   ;;  %s907_s26 = scalar_lea.vmem %s889_s20, %s1274_s8  }
 0x130 PF: > { %910 = sbr.rel (%p797_p12) target bundleno = 369 (0x171), region = 89  ;;  %s2733_s9 = ssub.s32 (!%p797_p12), %s2597_s30, %s2602_s29 }
 0x131   : > { %s916_s10 = sshrl.u32 (!%p797_p12), %s2597_s30, 3 }
 0x132   : > { %s2742_s16 = sshrl.u32 (!%p797_p12), %s916_s10, 5 }
 0x133   : > { %p1276_p6 = scmp.le.s32.totalorder (!%p797_p12), %s2742_s16, 0 }
 0x135   : > { %1162 = sbr.rel (%p1276_p6) target bundleno = 347 (0x15b), region = 186  ;;  %s3227_s21 = smov (!%p1276_p6), %s2595_s28 }
 0x136   : > { %s3228_s18 = smov (!%p1276_p6), %s2579_s17  ;;  %s2751_s19 = smov (!%p1276_p6), 0  }
 0x137   : > { %s2753_s20 = smov (!%p1276_p6), 0  }
 0x13a LB: >> { %v927_v1 = vld [vmem:[%s1611_s18] sm:$0xff]  ;;  %v929_v14 = vld [vmem:[%s1611_s18 + $0x8] sm:$0xff]  ;;  %v931_v30 = vld [vmem:[%s1611_s18 + $0x10] sm:$0xff]  ;;  %s991_s26 = sadd.s32 1, %s1615_s19  ;;  %s921_s20 = sadd.s32 1, %s1619_s20   ;;  %s1619_s20 = sphi %s2753_s20, %s921_s20   ;;  %s1615_s19 = sphi %s2751_s19, %s3231_s19   ;;  %s1611_s18 = sphi %s3228_s18, %s3230_s18   ;;  %s1607_s21 = sphi %s3227_s21, %s3229_s21  }
 0x13b   : >> { %928 = vst [vmem:[%s1607_s21] sm:$0xff] %v927_v1  ;;  %v933_v13 = vld [vmem:[%s1611_s18 + $0x18] sm:$0xff]  ;;  %p992_p7 = scmp.ge.s32.totalorder %s991_s26, %s2742_s16  ;;  %v935_v23 = vld [vmem:[%s1611_s18 + $0x20] sm:$0xff]  ;;  %v937_v19 = vld [vmem:[%s1611_s18 + $0x28] sm:$0xff]  ;;  %p920_p8 = scmp.ge.s32.totalorder %s921_s20, %s2742_s16 }
 0x13c   : >> { %930 = vst [vmem:[%s1607_s21 + $0x8] sm:$0xff] %v929_v14  ;;  %v939_v4 = vld [vmem:[%s1611_s18 + $0x30] sm:$0xff]  ;;  %v941_v12 = vld [vmem:[%s1611_s18 + $0x38] sm:$0xff]  ;;  %v943_v8 = vld [vmem:[%s1611_s18 + $0x40] sm:$0xff] }
 0x13d   : >> { %932 = vst [vmem:[%s1607_s21 + $0x10] sm:$0xff] %v931_v30  ;;  %s3247_s26 = smov (%p992_p7, %s991_s26), 0  ;;  %v945_v60 = vld [vmem:[%s1611_s18 + $0x48] sm:$0xff]  ;;  %v947_v16 = vld [vmem:[%s1611_s18 + $0x50] sm:$0xff]  ;;  %v949_v48 = vld [vmem:[%s1611_s18 + $0x58] sm:$0xff] }
 0x13e   : >> { %934 = vst [vmem:[%s1607_s21 + $0x18] sm:$0xff] %v933_v13  ;;  %s1277_s14 = sshll.u32 %s3247_s26, 8  ;;  %v951_v40 = vld [vmem:[%s1611_s18 + $0x60] sm:$0xff]  ;;  %v953_v17 = vld [vmem:[%s1611_s18 + $0x68] sm:$0xff]  ;;  %v955_v15 = vld [vmem:[%s1611_s18 + $0x70] sm:$0xff]  ;;  %s3231_s19 = smov %s3247_s26 }
 0x13f   : >> { %936 = vst [vmem:[%s1607_s21 + $0x20] sm:$0xff] %v935_v23  ;;  %s2785_s13 = scalar_lea.vmem %s2579_s17, %s1277_s14 [#allocation2]   ;;  %s2788_s15 = scalar_lea.vmem %s2595_s28, %s1277_s14   ;;  %v957_v62 = vld [vmem:[%s1611_s18 + $0x78] sm:$0xff]  ;;  %v959_v0 = vld [vmem:[%s1611_s18 + $0x80] sm:$0xff]  ;;  %v961_v38 = vld [vmem:[%s1611_s18 + $0x88] sm:$0xff] }
 0x140   : >> { %938 = vst [vmem:[%s1607_s21 + $0x28] sm:$0xff] %v937_v19  ;;  %v963_v18 = vld [vmem:[%s1611_s18 + $0x90] sm:$0xff]  ;;  %v965_v41 = vld [vmem:[%s1611_s18 + $0x98] sm:$0xff]  ;;  %v967_v9 = vld [vmem:[%s1611_s18 + $0xa0] sm:$0xff] }
 0x141   : >> { %940 = vst [vmem:[%s1607_s21 + $0x30] sm:$0xff] %v939_v4  ;;  %v969_v45 = vld [vmem:[%s1611_s18 + $0xa8] sm:$0xff]  ;;  %v971_v24 = vld [vmem:[%s1611_s18 + $0xb0] sm:$0xff]  ;;  %v973_v20 = vld [vmem:[%s1611_s18 + $0xb8] sm:$0xff] }
 0x142   : >> { %942 = vst [vmem:[%s1607_s21 + $0x38] sm:$0xff] %v941_v12  ;;  %v975_v57 = vld [vmem:[%s1611_s18 + $0xc0] sm:$0xff]  ;;  %v977_v49 = vld [vmem:[%s1611_s18 + $0xc8] sm:$0xff]  ;;  %v979_v27 = vld [vmem:[%s1611_s18 + $0xd0] sm:$0xff] }
 0x143   : >> { %944 = vst [vmem:[%s1607_s21 + $0x40] sm:$0xff] %v943_v8  ;;  %v981_v51 = vld [vmem:[%s1611_s18 + $0xd8] sm:$0xff]  ;;  %v983_v3 = vld [vmem:[%s1611_s18 + $0xe0] sm:$0xff]  ;;  %v985_v32 = vld [vmem:[%s1611_s18 + $0xe8] sm:$0xff] }
 0x144   : >> { %946 = vst [vmem:[%s1607_s21 + $0x48] sm:$0xff] %v945_v60  ;;  %v987_v28 = vld [vmem:[%s1611_s18 + $0xf0] sm:$0xff]  ;;  %v989_v59 = vld [vmem:[%s1611_s18 + $0xf8] sm:$0xff]  ;;  %s3230_s18 = smov %s2785_s13 }
 0x145   : >> { %948 = vst [vmem:[%s1607_s21 + $0x50] sm:$0xff] %v947_v16 }
 0x146   : >> { %950 = vst [vmem:[%s1607_s21 + $0x58] sm:$0xff] %v949_v48 }
 0x147   : >> { %952 = vst [vmem:[%s1607_s21 + $0x60] sm:$0xff] %v951_v40 }
 0x148   : >> { %954 = vst [vmem:[%s1607_s21 + $0x68] sm:$0xff] %v953_v17 }
 0x149   : >> { %956 = vst [vmem:[%s1607_s21 + $0x70] sm:$0xff] %v955_v15 }
 0x14a   : >> { %958 = vst [vmem:[%s1607_s21 + $0x78] sm:$0xff] %v957_v62 }
 0x14b   : >> { %960 = vst [vmem:[%s1607_s21 + $0x80] sm:$0xff] %v959_v0 }
 0x14c   : >> { %962 = vst [vmem:[%s1607_s21 + $0x88] sm:$0xff] %v961_v38 }
 0x14d   : >> { %964 = vst [vmem:[%s1607_s21 + $0x90] sm:$0xff] %v963_v18 }
 0x14e   : >> { %966 = vst [vmem:[%s1607_s21 + $0x98] sm:$0xff] %v965_v41 }
 0x14f   : >> { %968 = vst [vmem:[%s1607_s21 + $0xa0] sm:$0xff] %v967_v9 }
 0x150   : >> { %970 = vst [vmem:[%s1607_s21 + $0xa8] sm:$0xff] %v969_v45 }
 0x151   : >> { %972 = vst [vmem:[%s1607_s21 + $0xb0] sm:$0xff] %v971_v24 }
 0x152   : >> { %974 = vst [vmem:[%s1607_s21 + $0xb8] sm:$0xff] %v973_v20 }
 0x153   : >> { %976 = vst [vmem:[%s1607_s21 + $0xc0] sm:$0xff] %v975_v57 }
 0x154   : >> { %978 = vst [vmem:[%s1607_s21 + $0xc8] sm:$0xff] %v977_v49 }
 0x155   : >> { %980 = vst [vmem:[%s1607_s21 + $0xd0] sm:$0xff] %v979_v27 }
 0x156   : >> { %982 = vst [vmem:[%s1607_s21 + $0xd8] sm:$0xff] %v981_v51  ;;  %923 = sbr.rel (!%p920_p8) target bundleno = 314 (0x13a), region = 192 }
 0x157   : >> { %984 = vst [vmem:[%s1607_s21 + $0xe0] sm:$0xff] %v983_v3 }
 0x158   : >> { %986 = vst [vmem:[%s1607_s21 + $0xe8] sm:$0xff] %v985_v32 }
 0x159   : >> { %988 = vst [vmem:[%s1607_s21 + $0xf0] sm:$0xff] %v987_v28 }
 0x15a   : >> { %990 = vst [vmem:[%s1607_s21 + $0xf8] sm:$0xff] %v989_v59  ;;  %s3229_s21 = smov %s2788_s15 }
 0x15b PF: > { %s2854_s23 = sand.u32 31, %s916_s10   ;;  %s1293_s8 = sshll.u32 %s2742_s16, 8 }
 0x15c   : > { %s1002_s14 = scalar_lea.vmem %s2579_s17, %s1293_s8 [#allocation2]   ;;  %s1004_s12 = scalar_lea.vmem %s2595_s28, %s1293_s8  }
 0x15d   : > { %p1282_p9 = scmp.le.s32.totalorder %s2854_s23, 0 }
 0x15e   : > { %s1621_s13 = smov (!%p1282_p9), %s1004_s12   ;;  %s1625_s15 = smov (!%p1282_p9), %s1002_s14  }
 0x15f   : > { %1176 = sbr.rel (%p1282_p9) target bundleno = 364 (0x16c), region = 197  ;;  %s1629_s26 = smov (!%p1282_p9), 0  }
 0x160   : > { %s1633_s11 = smov (!%p1282_p9), 0  }
 0x164 LB: >> { %v1014_v47 = vld [vmem:[%s1627_s15] sm:$0xff]  ;;  %s1016_s10 = sadd.s32 1, %s1631_s26  ;;  %s1008_s11 = sadd.s32 1, %s1635_s11   ;;  %s1635_s11 = sphi %s1633_s11, %s1008_s11   ;;  %s1631_s26 = sphi %s1629_s26, %s1630_s26   ;;  %s1627_s15 = sphi %s1625_s15, %s1021_s15   ;;  %s1623_s13 = sphi %s1621_s13, %s1022_s13  }
 0x165   : >> { %1015 = vst [vmem:[%s1623_s13] sm:$0xff] %v1014_v47  ;;  %p1017_p10 = scmp.ge.s32.totalorder %s1016_s10, %s2854_s23  ;;  %p1007_p11 = scmp.ge.s32.totalorder %s1008_s11, %s2854_s23 }
 0x167   : >> { %s3249_s10 = smov (%p1017_p10, %s1016_s10), 0  ;;  %1010 = sbr.rel (!%p1007_p11) target bundleno = 356 (0x164), region = 203 }
 0x168   : >> { %s1283_s16 = sshll.u32 %s3249_s10, 3  ;;  %s1630_s26 = smov %s3249_s10  }
 0x169   : >> { %s1021_s15 = scalar_lea.vmem %s1002_s14, %s1283_s16 [#allocation2]   ;;  %s1022_s13 = scalar_lea.vmem %s1004_s12, %s1283_s16  }
 0x16c PF: > { %s1638_s21 = smov 1   ;;  %s3232_s20 = scalar_lea.vmem %s2579_s17, %s2733_s9 [#allocation2] }
 0x16d   : > { %s1023_s18 = sshll.u32 %s1638_s21, %s2602_s29  ;;  %s3233_s8 = scalar_lea.vmem %s2595_s28, %s2733_s9 }
 0x16e   : > { %s1285_s19 = sadd.s32 4294967295, %s1023_s18 }
 0x16f   : > { %v1033_v33 = vld [vmem:[%s3232_s20] sm:%s1285_s19] }
 0x170   : > { %1034 = vst [vmem:[%s3233_s8] sm:%s1285_s19] %v1033_v33 }
 0x171 PF: > { %p1286_p12 = scmp.ge.u32.totalorder %s2597_s30, 8 }
 0x172   : > { %s1639_s11 = smov (!%p1286_p12), 1  }
 0x173   : > { %783 = sbr.rel (%p1286_p12) target bundleno = 378 (0x17a), region = 60  ;;  %s784_s12 = sshll.u32 (!%p1286_p12), %s1639_s11, %s2597_s30 }
 0x174   : > { %s1287_s23 = sadd.s32 (!%p1286_p12), 4294967295, %s784_s12 }
 0x178   : > { %v794_v25 = vld [vmem:[%s2579_s17] sm:%s1287_s23] }
 0x179   : > { %795 = vst [vmem:[%s2595_s28] sm:%s1287_s23] %v794_v25 }
 0x17a PF: > { %s16_s25 = sadd.s32 1, %s1571_s25   ;;  %s3234_s21 = smov %s1559_s22 }
 0x17b   : > { %p13_p13 = scmp.ge.s32.totalorder %s16_s25, 5   ;;  %s3235_s22 = smov %s1716_s7 }
 0x17c   : > { %s3236_s23 = smov %s1567_s24  ;;  %s3237_s24 = smov %s3239_s27 }
 0x17d   :  { %15 = sbr.rel (!%p13_p13) target bundleno = 3 (0x3), region = 214 }

</bundles_post_ra>
